<compile_context>
chip_gen: v7x
topology: tpu7x:2x2x1
jax: 0.10.0
libtpu: 0.0.40
codegen_flags: <defaults>
</compile_context>

<pallas_src>
import functools

import jax
import jax.numpy as jnp
from jax.experimental import pallas as pl
from jax.experimental.pallas import tpu as pltpu

LANE = 128
SUBLANE = 8
NEG_SLOPE = 0.001  # the torch module uses F.leaky_relu(..., negative_slope=0.001)


def _round_up(x: int, m: int) -> int:
    return (x + m - 1) // m * m


def _dqn_kernel(x_ref, w_ref, b_ref, o_ref, *, n_linear: int):
    """x_ref: (TB, F) f32 | w_ref: (L, F, F) bf16 | b_ref: (L, 1, F) f32 | o_ref: (TB, F) f32."""
    h = x_ref[...]
    # Unrolled Python loop: full scheduler visibility, MXU pops overlap VPU leaky_relu.
    for i in range(n_linear):
        acc = jnp.dot(h.astype(jnp.bfloat16), w_ref[i],
                      preferred_element_type=jnp.float32)
        acc = acc + b_ref[i]
        h = jnp.where(acc >= 0, acc, NEG_SLOPE * acc)
    o_ref[...] = h


def prepare_params(weights, biases):
    """Pad + stack parameters ONCE (hoisted out of the per-call forward path).

    weights[i]: (in_i, out_i) f32 (already transposed vs. torch's (out, in));
    biases[i]:  (out_i,) f32.
    Returns (w_stack bf16 (L,F,F), b_stack f32 (L,1,F)).  Zero padding is exact.
    """
    max_dim = max(max(w.shape) for w in weights)
    pad_f = max(LANE, _round_up(max_dim, LANE))
    w_stack = jnp.stack([
        jnp.pad(w, ((0, pad_f - w.shape[0]), (0, pad_f - w.shape[1])))
        for w in weights
    ]).astype(jnp.bfloat16)
    b_stack = jnp.stack([
        jnp.pad(b, (0, pad_f - b.shape[0]))[None, :] for b in biases
    ]).astype(jnp.float32)
    return w_stack, b_stack


@functools.partial(jax.jit, static_argnames=("n_actions", "block_b"))
def dqn_apply(x, w_stack, b_stack, *, n_actions, block_b=256):
    """Batched forward.  x: (B, n_obsv) f32 -> (B, n_actions) f32."""
    B, n_obsv = x.shape
    n_linear, pad_f, _ = w_stack.shape

    tb = min(block_b, _round_up(B, SUBLANE))     # small batches: tiny tile; big: 256 rows
    b_pad = _round_up(B, tb)
    x_p = jnp.pad(x.astype(jnp.float32), ((0, b_pad - B), (0, pad_f - n_obsv)))

    kernel = functools.partial(_dqn_kernel, n_linear=n_linear)

    out_p = pl.pallas_call(
        kernel,
        out_shape=jax.ShapeDtypeStruct((b_pad, pad_f), jnp.float32),
        grid=(b_pad // tb,),
        in_specs=[
            pl.BlockSpec((tb, pad_f), lambda i: (i, 0)),                 # batch tile
            pl.BlockSpec((n_linear, pad_f, pad_f), lambda i: (0, 0, 0)),  # weights resident
            pl.BlockSpec((n_linear, 1, pad_f), lambda i: (0, 0, 0)),      # biases resident
        ],
        out_specs=pl.BlockSpec((tb, pad_f), lambda i: (i, 0)),
        compiler_params=pltpu.CompilerParams(dimension_semantics=("parallel",)),
    )(x_p, w_stack, b_stack)

    return out_p[:B, :n_actions]


def dqn_forward(x, w_stack, b_stack, *, n_actions):
    """Module-semantics forward: 1-D observation (n_obsv,) -> 1-D q-values (n_actions,)."""
    assert x.ndim == 1
    return dqn_apply(x[None, :], w_stack, b_stack, n_actions=n_actions)[0]


def init_dqn_params(key, n_obsv, n_actions, n_layer, n_layer_size):
    """Mimics torch.nn.Linear default init (U(-k, k), k = 1/sqrt(fan_in)).
    Weights stored as (in_features, out_features)."""
    dims = [n_obsv] + [n_layer_size] * (n_layer + 1) + [n_actions]
    weights, biases = [], []
    for i in range(len(dims) - 1):
        fan_in, fan_out = dims[i], dims[i + 1]
        k = 1.0 / jnp.sqrt(jnp.float32(fan_in))
        key, kw, kb = jax.random.split(key, 3)
        weights.append(jax.random.uniform(kw, (fan_in, fan_out), jnp.float32, -k, k))
        biases.append(jax.random.uniform(kb, (fan_out,), jnp.float32, -k, k))
    return weights, biases


def dqn_forward_ref(x, weights, biases):
    """Pure-JAX f32 reference of the torch forward."""
    h = x
    for w, b in zip(weights, biases):
        h = h @ w + b
        h = jnp.where(h >= 0, h, NEG_SLOPE * h)
    return h


# TODO(synk): fit() (SmoothL1Loss + Adam + grad clipping) is training-side and not
# part of the forward pass; it is intentionally not implemented as a kernel.

if __name__ == "__main__":
    # Module defaults: n_obsv=4 (CartPole-like), n_actions=2, n_layer=1, n_layerSize=6.
    n_obsv, n_actions, n_layer, n_layer_size = 4, 2, 1, 6

    key = jax.random.PRNGKey(0)
    key, kx, kb = jax.random.split(key, 3)

    weights, biases = init_dqn_params(key, n_obsv, n_actions, n_layer, n_layer_size)
    # Pad/stack ONCE (not per forward call).
    w_stack, b_stack = prepare_params(weights, biases)

    # 1) Module-semantics single observation (x.dim() == 1), like the torch forward.
    x1 = jax.random.normal(kx, (n_obsv,), jnp.float32)
    q1 = jax.block_until_ready(dqn_forward(x1, w_stack, b_stack, n_actions=n_actions))
    q1_ref = dqn_forward_ref(x1, weights, biases)
    assert q1.shape == (n_actions,)
    assert jnp.allclose(q1, q1_ref, atol=2e-2, rtol=2e-2), (q1, q1_ref)

    # 2) Batched path (amortizes launch + weight DMA; exercises the batch grid).
    B = 512
    xb = jax.random.normal(kb, (B, n_obsv), jnp.float32)
    qb = jax.block_until_ready(dqn_apply(xb, w_stack, b_stack, n_actions=n_actions))
    qb_ref = jax.vmap(lambda r: dqn_forward_ref(r, weights, biases))(xb)
    assert qb.shape == (B, n_actions)
    assert jnp.allclose(qb, qb_ref, atol=2e-2, rtol=2e-2), (qb, qb_ref)

    print("KERNEL_OK")
</pallas_src>

<mosaic_0001>
module attributes {stable_mosaic.version = 11 : i64} {
  func.func @_dqn_kernel(%arg0: i32, %arg1: memref<8x128xf32, #tpu.memory_space<vmem>>, %arg2: memref<3x128x128xbf16, #tpu.memory_space<vmem>>, %arg3: memref<3x1x128xf32, #tpu.memory_space<vmem>>, %arg4: memref<8x128xf32, #tpu.memory_space<vmem>>) attributes {dimension_semantics = [#tpu.dimension_semantics<parallel>], iteration_bounds = array<i64: 1>, scalar_prefetch = 0 : i64, scratch_operands = 0 : i64, tpu.core_type = #tpu.core_type<tc>, window_params = [{transform_indices = @transform_0, window_bounds = array<i64: 8, 128>}, {pipeline_mode = #tpu.pipeline_mode<synchronous>, transform_indices = @transform_1, window_bounds = array<i64: 3, 128, 128>}, {pipeline_mode = #tpu.pipeline_mode<synchronous>, transform_indices = @transform_2, window_bounds = array<i64: 3, 1, 128>}, {transform_indices = @transform_3, window_bounds = array<i64: 8, 128>}]} {
    %c0 = arith.constant 0 : index
    %c0_0 = arith.constant 0 : index
    %0 = vector.load %arg1[%c0, %c0_0] : memref<8x128xf32, #tpu.memory_space<vmem>>, vector<8x128xf32>
    %1 = arith.truncf %0 : vector<8x128xf32> to vector<8x128xbf16>
    %c0_1 = arith.constant 0 : index
    %c0_2 = arith.constant 0 : index
    %c0_3 = arith.constant 0 : index
    %2 = vector.load %arg2[%c0_1, %c0_2, %c0_3] : memref<3x128x128xbf16, #tpu.memory_space<vmem>>, vector<1x128x128xbf16>
    %3 = vector.shape_cast %2 : vector<1x128x128xbf16> to vector<128x128xbf16>
    %cst = arith.constant dense<0.000000e+00> : vector<8x128xf32>
    %4 = tpu.matmul %1, %3, %cst {dimension_numbers = #tpu.dot_dimension_numbers<[1], [0], [0], [1], [0, 0, 1, 1], [], []>} : vector<8x128xbf16>, vector<128x128xbf16>, vector<8x128xf32> -> vector<8x128xf32>
    %c0_4 = arith.constant 0 : index
    %c0_5 = arith.constant 0 : index
    %c0_6 = arith.constant 0 : index
    %5 = vector.load %arg3[%c0_4, %c0_5, %c0_6] : memref<3x1x128xf32, #tpu.memory_space<vmem>>, vector<1x1x128xf32>
    %6 = vector.shape_cast %5 : vector<1x1x128xf32> to vector<1x128xf32>
    %7 = vector.broadcast %6 : vector<1x128xf32> to vector<8x128xf32>
    %8 = arith.addf %4, %7 : vector<8x128xf32>
    %cst_7 = arith.constant 0.000000e+00 : f32
    %9 = vector.broadcast %cst_7 : f32 to vector<8x128xf32>
    %10 = arith.cmpf oge, %8, %9 : vector<8x128xf32>
    %cst_8 = arith.constant 1.000000e-03 : f32
    %11 = vector.broadcast %cst_8 : f32 to vector<8x128xf32>
    %12 = arith.mulf %11, %8 : vector<8x128xf32>
    %13 = arith.select %10, %8, %12 : vector<8x128xi1>, vector<8x128xf32>
    %14 = arith.truncf %13 : vector<8x128xf32> to vector<8x128xbf16>
    %c1 = arith.constant 1 : index
    %c0_9 = arith.constant 0 : index
    %c0_10 = arith.constant 0 : index
    %15 = vector.load %arg2[%c1, %c0_9, %c0_10] : memref<3x128x128xbf16, #tpu.memory_space<vmem>>, vector<1x128x128xbf16>
    %16 = vector.shape_cast %15 : vector<1x128x128xbf16> to vector<128x128xbf16>
    %cst_11 = arith.constant dense<0.000000e+00> : vector<8x128xf32>
    %17 = tpu.matmul %14, %16, %cst_11 {dimension_numbers = #tpu.dot_dimension_numbers<[1], [0], [0], [1], [0, 0, 1, 1], [], []>} : vector<8x128xbf16>, vector<128x128xbf16>, vector<8x128xf32> -> vector<8x128xf32>
    %c1_12 = arith.constant 1 : index
    %c0_13 = arith.constant 0 : index
    %c0_14 = arith.constant 0 : index
    %18 = vector.load %arg3[%c1_12, %c0_13, %c0_14] : memref<3x1x128xf32, #tpu.memory_space<vmem>>, vector<1x1x128xf32>
    %19 = vector.shape_cast %18 : vector<1x1x128xf32> to vector<1x128xf32>
    %20 = vector.broadcast %19 : vector<1x128xf32> to vector<8x128xf32>
    %21 = arith.addf %17, %20 : vector<8x128xf32>
    %cst_15 = arith.constant 0.000000e+00 : f32
    %22 = vector.broadcast %cst_15 : f32 to vector<8x128xf32>
    %23 = arith.cmpf oge, %21, %22 : vector<8x128xf32>
    %cst_16 = arith.constant 1.000000e-03 : f32
    %24 = vector.broadcast %cst_16 : f32 to vector<8x128xf32>
    %25 = arith.mulf %24, %21 : vector<8x128xf32>
    %26 = arith.select %23, %21, %25 : vector<8x128xi1>, vector<8x128xf32>
    %27 = arith.truncf %26 : vector<8x128xf32> to vector<8x128xbf16>
    %c2 = arith.constant 2 : index
    %c0_17 = arith.constant 0 : index
    %c0_18 = arith.constant 0 : index
    %28 = vector.load %arg2[%c2, %c0_17, %c0_18] : memref<3x128x128xbf16, #tpu.memory_space<vmem>>, vector<1x128x128xbf16>
    %29 = vector.shape_cast %28 : vector<1x128x128xbf16> to vector<128x128xbf16>
    %cst_19 = arith.constant dense<0.000000e+00> : vector<8x128xf32>
    %30 = tpu.matmul %27, %29, %cst_19 {dimension_numbers = #tpu.dot_dimension_numbers<[1], [0], [0], [1], [0, 0, 1, 1], [], []>} : vector<8x128xbf16>, vector<128x128xbf16>, vector<8x128xf32> -> vector<8x128xf32>
    %c2_20 = arith.constant 2 : index
    %c0_21 = arith.constant 0 : index
    %c0_22 = arith.constant 0 : index
    %31 = vector.load %arg3[%c2_20, %c0_21, %c0_22] : memref<3x1x128xf32, #tpu.memory_space<vmem>>, vector<1x1x128xf32>
    %32 = vector.shape_cast %31 : vector<1x1x128xf32> to vector<1x128xf32>
    %33 = vector.broadcast %32 : vector<1x128xf32> to vector<8x128xf32>
    %34 = arith.addf %30, %33 : vector<8x128xf32>
    %cst_23 = arith.constant 0.000000e+00 : f32
    %35 = vector.broadcast %cst_23 : f32 to vector<8x128xf32>
    %36 = arith.cmpf oge, %34, %35 : vector<8x128xf32>
    %cst_24 = arith.constant 1.000000e-03 : f32
    %37 = vector.broadcast %cst_24 : f32 to vector<8x128xf32>
    %38 = arith.mulf %37, %34 : vector<8x128xf32>
    %39 = arith.select %36, %34, %38 : vector<8x128xi1>, vector<8x128xf32>
    %c0_25 = arith.constant 0 : index
    %c0_26 = arith.constant 0 : index
    %40 = vector.load %arg4[%c0_25, %c0_26] : memref<8x128xf32, #tpu.memory_space<vmem>>, vector<8x128xf32>
    tpu.vector_store %arg4[%c0_25, %c0_26], %39 {strides = array<i32>} : memref<8x128xf32, #tpu.memory_space<vmem>>, vector<8x128xf32>,
    return
  }
  func.func @transform_0(%arg0: i32) -> (i32, i32) {
    %c0_i32 = arith.constant 0 : i32
    %c0_i32_0 = arith.constant 0 : i32
    return %arg0, %c0_i32 : i32, i32
  }
  func.func @transform_1(%arg0: i32) -> (i32, i32, i32) {
    %c0_i32 = arith.constant 0 : i32
    %c0_i32_0 = arith.constant 0 : i32
    %c0_i32_1 = arith.constant 0 : i32
    %c0_i32_2 = arith.constant 0 : i32
    return %c0_i32, %c0_i32_0, %c0_i32_1 : i32, i32, i32
  }
  func.func @transform_2(%arg0: i32) -> (i32, i32, i32) {
    %c0_i32 = arith.constant 0 : i32
    %c0_i32_0 = arith.constant 0 : i32
    %c0_i32_1 = arith.constant 0 : i32
    %c0_i32_2 = arith.constant 0 : i32
    return %c0_i32, %c0_i32_0, %c0_i32_1 : i32, i32, i32
  }
  func.func @transform_3(%arg0: i32) -> (i32, i32) {
    %c0_i32 = arith.constant 0 : i32
    %c0_i32_0 = arith.constant 0 : i32
    return %arg0, %c0_i32 : i32, i32
  }
}

</mosaic_0001>

<bundles_post_ra>
// kernel: dqn_apply.1
= control target key start
LH: loop header
LB: loop body
LE: loop exit
PB: predicated region body
PF: predicated region fallthrough
CT: control target
= control target key end

     0   :  { %8 = vsyncpa [#allocation3], 0  ;;  %s554_s12 = smov [#allocation2]   ;;  %s636_s0 = inlined_call_operand.vmem [shape: f32[8,128], index: 0, kind: input, shape index: {}]   ;;  %s637_s1 = inlined_call_operand.hbm [shape: bf16[3,128,128], index: 1, kind: input, shape index: {}]   ;;  %s638_s2 = inlined_call_operand.vmem [shape: f32[3,1,128], index: 2, kind: input, shape index: {}]   ;;  %s639_s3 = inlined_call_operand.vmem [shape: f32[8,128], index: 3, kind: output, shape index: {}]  }
   0x1   :  { %s16_s13 = sshll.u32 %s554_s12, 4  ;;  %s530_s16 = scalar_lea.hbm %s637_s1, 3072  ;;  %s17_s13 = int_to_ptr.vmem [resolvable:$true] %s16_s13 }
   0x2   :  { %p531_p0 = scmp.ne.s32.totalorder %s637_s1, %s530_s16  ;;  %p534_p1 = scmp.lt.u32.totalorder %s530_s16, %s637_s1 }
   0x4   :  { %p536_p2 = pnand %p534_p1, %p531_p0 }
   0x6   :  { %539 = shalt.err (!%p536_p2)
}
   0x7   :  { %s540_s21 = scalar_lea.vmem %s17_s13, 3072  ;;  %p545_p4 = scmp.lt.s32.totalorder %s17_s13, %s17_s13 }
   0x8   :  { %p541_p3 = scmp.ne.s32.totalorder %s17_s13, %s540_s21  ;;  %p546_p5 = scmp.lt.s32.totalorder %s540_s21, %s540_s21 }
   0xa   :  { %p547_p6 = por %p546_p5, %p545_p4 }
   0xc   :  { %p548_p7 = pnand %p547_p6, %p541_p3 }
   0xe   :  { %551 = shalt.err (!%p548_p7)
}
   0xf   :  { %s555_s22 = smov 64   ;;  %s556_s23 = smov 4  }
  0x10   :  { %22 = dma.hbm_to_vmem [thread:$0]  %s637_s1, 3072, %s17_s13, [#allocation3], %s555_s22, %s555_s22, %s556_s23  }
  0x11   :  { %552 = dma.done.wait [#allocation3], 3072  }
  0x12   :  { %553 = vsyncadd [#allocation3], 4294964224  ;;  %v557_v0 = vmov 0.0   ;;  %vm558_vm0 = vmmov 0   ;;  %v506_v1 = vld [vmem:[#allocation2] sm:$0xff]   ;;  %v507_v2 = vld [vmem:[#allocation2 + $0x8] sm:$0xff]  }
  0x13   :  { %441 = vmatprep.subr.bf16.mxu0 %v557_v0  ;;  %457 = vmatprep.mubr.msk.bf16.mxu0 %vm558_vm0, %v557_v0  ;;  %v508_v3 = vld [vmem:[#allocation2 + $0x10] sm:$0xff]   ;;  %v514_v4 = vld [vmem:[#allocation2 + $0x40] sm:$0xff]   ;;  %v509_v5 = vld [vmem:[#allocation2 + $0x18] sm:$0xff]  }
  0x14   :  { %461 = vmatprep.subr.bf16.mxu1 %v557_v0  ;;  %477 = vmatprep.mubr.msk.bf16.mxu1 %vm558_vm0, %v557_v0  ;;  %v515_v6 = vld [vmem:[#allocation2 + $0x48] sm:$0xff]   ;;  %v510_v7 = vld [vmem:[#allocation2 + $0x20] sm:$0xff]   ;;  %v516_v8 = vld [vmem:[#allocation2 + $0x50] sm:$0xff]  }
  0x15   :  { %442 = vmatpush3.bf16.msra.mxu0 %v506_v1  ;;  %462 = vmatpush3.bf16.msra.mxu1 %v514_v4  ;;  %v511_v9 = vld [vmem:[#allocation2 + $0x28] sm:$0xff]   ;;  %v517_v10 = vld [vmem:[#allocation2 + $0x58] sm:$0xff]   ;;  %v512_v11 = vld [vmem:[#allocation2 + $0x30] sm:$0xff]  }
  0x16   :  { %443 = vmatprep.subr.bf16.mxu0 %v557_v0  ;;  %463 = vmatprep.subr.bf16.mxu1 %v557_v0  ;;  %v518_v12 = vld [vmem:[#allocation2 + $0x60] sm:$0xff]   ;;  %v513_v13 = vld [vmem:[#allocation2 + $0x38] sm:$0xff]   ;;  %v519_v15 = vld [vmem:[#allocation2 + $0x68] sm:$0xff]  }
  0x17   :  { %v29_v14 = vld [vmem:[%s636_s0] sm:$0xff]  ;;  %v520_v17 = vld [vmem:[#allocation2 + $0x70] sm:$0xff]   ;;  %v521_v18 = vld [vmem:[#allocation2 + $0x78] sm:$0xff]  }
  0x18   :  { %v30_v16 = vpack.c.bf16 %v29_v14, %v29_v14  ;;  %v522_v19 = vld [vmem:[#allocation2 + $0x80] sm:$0xff]   ;;  %v523_v20 = vld [vmem:[#allocation2 + $0x88] sm:$0xff]   ;;  %v524_v21 = vld [vmem:[#allocation2 + $0x90] sm:$0xff]  }
  0x19   :  { %444 = vmatpush3.bf16.msra.mxu0 %v507_v2  ;;  %464 = vmatpush3.bf16.msra.mxu1 %v515_v6  ;;  %v525_v22 = vld [vmem:[#allocation2 + $0x98] sm:$0xff]   ;;  %v526_v23 = vld [vmem:[#allocation2 + $0xa0] sm:$0xff]   ;;  %v527_v24 = vld [vmem:[#allocation2 + $0xa8] sm:$0xff]  }
  0x1a   :  { %445 = vmatprep.subr.bf16.mxu0 %v557_v0  ;;  %465 = vmatprep.subr.bf16.mxu1 %v557_v0  ;;  %v385_v25 = vld [vmem:[%s638_s2] ss:$0 sm:$0xff]  ;;  %v528_v34 = vld [vmem:[#allocation2 + $0xb0] sm:$0xff]   ;;  %v529_v35 = vld [vmem:[#allocation2 + $0xb8] sm:$0xff]  }
  0x1b   :  { %v395_v36 = vld [vmem:[%s638_s2 + $0x1] ss:$0 sm:$0xff]  ;;  %v405_v45 = vld [vmem:[%s638_s2 + $0x2] ss:$0 sm:$0xff] }
  0x1d   :  { %446 = vmatpush3.bf16.msra.mxu0 %v508_v3  ;;  %466 = vmatpush3.bf16.msra.mxu1 %v516_v8 }
  0x1e   :  { %447 = vmatprep.subr.bf16.mxu0 %v557_v0  ;;  %467 = vmatprep.subr.bf16.mxu1 %v557_v0 }
  0x21   :  { %448 = vmatpush3.bf16.msra.mxu0 %v509_v5  ;;  %468 = vmatpush3.bf16.msra.mxu1 %v517_v10 }
  0x22   :  { %449 = vmatprep.subr.bf16.mxu0 %v557_v0  ;;  %469 = vmatprep.subr.bf16.mxu1 %v557_v0 }
  0x25   :  { %450 = vmatpush3.bf16.msra.mxu0 %v510_v7  ;;  %470 = vmatpush3.bf16.msra.mxu1 %v518_v12 }
  0x26   :  { %451 = vmatprep.subr.bf16.mxu0 %v557_v0  ;;  %471 = vmatprep.subr.bf16.mxu1 %v557_v0 }
  0x29   :  { %452 = vmatpush3.bf16.msra.mxu0 %v511_v9  ;;  %472 = vmatpush3.bf16.msra.mxu1 %v519_v15 }
  0x2a   :  { %453 = vmatprep.subr.bf16.mxu0 %v557_v0  ;;  %473 = vmatprep.subr.bf16.mxu1 %v557_v0 }
  0x2d   :  { %454 = vmatpush3.bf16.msra.mxu0 %v512_v11  ;;  %474 = vmatpush3.bf16.msra.mxu1 %v520_v17 }
  0x2e   :  { %455 = vmatprep.subr.bf16.mxu0 %v557_v0  ;;  %475 = vmatprep.subr.bf16.mxu1 %v557_v0 }
  0x31   :  { %456 = vmatpush3.bf16.msra.mxu0 %v513_v13  ;;  %476 = vmatpush3.bf16.msra.mxu1 %v521_v18 }
  0x32   :  { %481 = vmatprep.subr.bf16.mxu0 %v557_v0 }
  0x34   :  { %458 = vmatmul.mubr.bf16.vlgmr.msra.gmra.mrb[0].mxu0 %v30_v16 }
  0x35   :  { %497 = vmatprep.mubr.msk.bf16.mxu0 %vm558_vm0, %v557_v0  ;;  %482 = vmatpush3.bf16.msra.mxu0 %v522_v19 }
  0x36   :  { %483 = vmatprep.subr.bf16.mxu0 %v557_v0 }
  0x39   :  { %484 = vmatpush3.bf16.msra.mxu0 %v523_v20 }
  0x3a   :  { %485 = vmatprep.subr.bf16.mxu0 %v557_v0 }
  0x3d   :  { %486 = vmatpush3.bf16.msra.mxu0 %v524_v21 }
  0x3e   :  { %487 = vmatprep.subr.bf16.mxu0 %v557_v0 }
  0x41   :  { %488 = vmatpush3.bf16.msra.mxu0 %v525_v22 }
  0x42   :  { %489 = vmatprep.subr.bf16.mxu0 %v557_v0 }
  0x45   :  { %490 = vmatpush3.bf16.msra.mxu0 %v526_v23 }
  0x46   :  { %491 = vmatprep.subr.bf16.mxu0 %v557_v0 }
  0x49   :  { %492 = vmatpush3.bf16.msra.mxu0 %v527_v24 }
  0x4a   :  { %493 = vmatprep.subr.bf16.mxu0 %v557_v0 }
  0x4d   :  { %494 = vmatpush3.bf16.msra.mxu0 %v528_v34 }
  0x4e   :  { %495 = vmatprep.subr.bf16.mxu0 %v557_v0 }
  0x51   :  { %496 = vmatpush3.bf16.msra.mxu0 %v529_v35 }
 0x107   :  { %v136_v26 = vpop.f32.mrb[0].mxu0 }
 0x108   :  { %v137_v27 = vadd.f32 %v385_v25, %v136_v26  ;;  %v459_v28 = vpop.f32.mrb[1].mxu0 }
 0x109   :  { %v139_v29 = vpop.f32.mrb[2].mxu0 }
 0x10a   :  { %vm142_vm1 = vcmp.ge.f32.partialorder %v137_v27, 0.0  ;;  %v143_v30 = vmul.f32 0.001, %v137_v27  ;;  %v460_v31 = vpop.f32.mrb[3].mxu0 }
 0x10c   :  { %v144_v32 = vsel %vm142_vm1, %v137_v27, %v143_v30 }
 0x10d   :  { %v145_v33 = vpack.c.bf16 %v144_v32, %v144_v32 }
 0x10f   :  { %478 = vmatmul.mubr.bf16.vlgmr.msra.gmra.mrb[0].mxu1 %v145_v33 }
 0x1e2   :  { %v253_v37 = vpop.f32.mrb[0].mxu1 }
 0x1e3   :  { %v254_v38 = vadd.f32 %v395_v36, %v253_v37  ;;  %v479_v39 = vpop.f32.mrb[1].mxu1 }
 0x1e4   :  { %v256_v40 = vpop.f32.mrb[2].mxu1 }
 0x1e5   :  { %vm259_vm2 = vcmp.ge.f32.partialorder %v254_v38, 0.0  ;;  %v260_v41 = vmul.f32 0.001, %v254_v38  ;;  %v480_v42 = vpop.f32.mrb[3].mxu1 }
 0x1e7   :  { %v261_v43 = vsel %vm259_vm2, %v254_v38, %v260_v41 }
 0x1e8   :  { %v262_v44 = vpack.c.bf16 %v261_v43, %v261_v43 }
 0x1ea   :  { %498 = vmatmul.mubr.bf16.vlgmr.msra.gmra.mrb[4].mxu0 %v262_v44 }
 0x2bd   :  { %v370_v46 = vpop.f32.mrb[4].mxu0 }
 0x2be   :  { %v371_v47 = vadd.f32 %v405_v45, %v370_v46  ;;  %v499_v48 = vpop.f32.mrb[5].mxu0 }
 0x2bf   :  { %v373_v49 = vpop.f32.mrb[6].mxu0 }
 0x2c0   :  { %vm376_vm3 = vcmp.ge.f32.partialorder %v371_v47, 0.0  ;;  %v377_v50 = vmul.f32 0.001, %v371_v47  ;;  %v500_v51 = vpop.f32.mrb[7].mxu0 }
 0x2c2   :  { %v378_v52 = vsel %vm376_vm3, %v371_v47, %v377_v50 }
 0x2c3   :  { %379 = vst [vmem:[%s639_s3] sm:$0xff] %v378_v52 }
 0x2c4   :  { %384 = vsyncpa [#allocation3], 1 }

</bundles_post_ra>
